<compile_context>
chip_gen: v5e
topology: v5e:2x2
jax: 0.10.0
libtpu: 0.0.40
codegen_flags: <defaults>
</compile_context>

<pallas_src>
import functools

import jax
import jax.numpy as jnp
from jax.experimental import pallas as pl
from jax.experimental.pallas import tpu as pltpu


def _smooth_ce_kernel(pred_ref, gold_ref, out_ref, *, eps, n_total, num_classes):
    i = pl.program_id(0)

    x_native = pred_ref[...]                              # (TM, C) native dtype
    g = gold_ref[...]                                     # (TM, 1) int32
    tm, c = x_native.shape

    # --- Work done on the NATIVE dtype (half the vregs for bf16 inputs). ---
    class_ids = jax.lax.broadcasted_iota(jnp.int32, (tm, c), 1)
    on_gold = class_ids == g
    # Exactly one selected element per row -> bf16 accumulation is exact.
    x_gold = jnp.sum(jnp.where(on_gold, x_native, jnp.zeros_like(x_native)),
                     axis=1, keepdims=True).astype(jnp.float32)       # (TM, 1)
    row_max = jnp.max(x_native, axis=1, keepdims=True).astype(jnp.float32)

    # --- Full-tile f32 work: one cast, one sub, one exp, two reduces. ---
    x = x_native.astype(jnp.float32)
    row_sum = jnp.sum(x, axis=1, keepdims=True)                       # (TM, 1)
    shifted = x - row_max
    lse = jnp.log(jnp.sum(jnp.exp(shifted), axis=1, keepdims=True))   # (TM, 1)

    # Decomposed smoothed loss (no materialized weight matrix):
    #   sum_j shifted_j = row_sum - C * row_max
    #   loss_row = -off * (sum_j shifted_j - C * lse)
    #              - (1 - eps - off) * (shifted[gold] - lse)
    shifted_sum = row_sum - num_classes * row_max
    shifted_gold = x_gold - row_max

    off_val = eps / (num_classes - 1) if num_classes > 1 else 0.0
    gold_coef = 1.0 - eps - off_val

    row_loss = ((-off_val) * (shifted_sum - num_classes * lse)
                - gold_coef * (shifted_gold - lse))                   # (TM, 1)

    # Mask rows past the true row count (last, possibly partial, tile). Keep
    # this mask BEFORE the tile reduction -- jnp.where does not propagate
    # NaN/Inf from the unselected (padded-garbage) branch.
    row_ids = i * tm + jax.lax.broadcasted_iota(jnp.int32, (tm, 1), 0)
    row_loss = jnp.where(row_ids < n_total, row_loss, 0.0)

    tile_sum = jnp.sum(row_loss)

    # Independent per-tile partial: lane-dense (1, 8, 128) block, tile sum in
    # element [0, 0, 0], zeros elsewhere (exact when summed in the wrapper).
    sub = jax.lax.broadcasted_iota(jnp.int32, (1, 8, 128), 1)
    lane = jax.lax.broadcasted_iota(jnp.int32, (1, 8, 128), 2)
    out_ref[...] = jnp.where((sub == 0) & (lane == 0), tile_sum, 0.0)


def _round_up(v, m):
    return ((v + m - 1) // m) * m


def _tpu_budgets():
    """Per-generation (target native-logit bytes per block, vmem_limit_bytes)."""
    vmem_phys = None
    try:
        info = pltpu.get_tpu_info()
        vmem_phys = int(getattr(info, "vmem_capacity_bytes", 0)) or None
    except Exception:
        vmem_phys = None
    if vmem_phys is not None and vmem_phys <= 64 * 1024 * 1024:
        # v7x: 64 MiB physical VMEM but ~3.2 TB/s HBM -> big blocks, tight limit.
        return 4 * 1024 * 1024, 48 * 1024 * 1024
    # v5e / v6e: 128 MiB physical VMEM -> plenty of headroom for big blocks.
    return 6 * 1024 * 1024, 64 * 1024 * 1024


def _pick_tm(n, c, itemsize, target_block_bytes, vmem_limit_bytes):
    """Row-tile size: byte-budgeted (DMA target + VMEM footprint), not row-capped."""
    sub = max(8, 32 // max(1, itemsize))   # sublane granule (f32:8, bf16:16, i8:32)

    # DMA-efficiency target: big native-dtype blocks (per-step overhead ~0.35 us).
    bytes_per_row = max(1, c * itemsize)
    tm = target_block_bytes // bytes_per_row

    # VMEM ceiling: 2x double-buffered native input + ~5 full-tile f32/i32 temps
    # (x_f32, shifted, exp, iota, select). Keep 25% headroom under the limit.
    footprint_per_row = max(1, c * (2 * itemsize + 24))
    tm_vmem = int(0.75 * vmem_limit_bytes) // footprint_per_row
    tm = min(tm, tm_vmem)

    # Megacore guard: keep >= ~8 grid steps (when N allows) so both v7x
    # TensorCores get work under dimension_semantics=("parallel",).
    tm_mega = _round_up(-(-n // 8), sub)   # ceil(n/8), sublane-aligned
    tm = min(tm, max(sub, tm_mega))

    tm = max(sub, tm - tm % sub)
    n_pad = _round_up(n, sub)
    return max(sub, min(tm, n_pad))


def smooth_cross_entropy(pred, gold, use_smoothing=True, eps=0.2, *, tm=None):
    """Forward pass of SmoothCrossEntropy.

    pred: float array (..., C) of logits (any float dtype; kept native for DMA).
    gold: int array (...) of class indices.
    Returns a scalar float32 loss.
    """
    eps = float(eps) if use_smoothing else 0.0     # eps=0 <=> plain cross entropy
    if pred.ndim > 2:
        pred = pred.reshape(-1, pred.shape[-1])
    gold = gold.reshape(-1, 1).astype(jnp.int32)
    n, c = pred.shape

    target_block_bytes, vmem_limit = _tpu_budgets()
    if tm is None:
        tm = _pick_tm(n, c, pred.dtype.itemsize, target_block_bytes, vmem_limit)
    num_tiles = pl.cdiv(n, tm)

    partials = pl.pallas_call(
        functools.partial(_smooth_ce_kernel, eps=eps, n_total=n, num_classes=c),
        out_shape=jax.ShapeDtypeStruct((num_tiles, 8, 128), jnp.float32),
        grid_spec=pltpu.PrefetchScalarGridSpec(
            num_scalar_prefetch=0,
            grid=(num_tiles,),
            in_specs=[
                pl.BlockSpec((tm, c), lambda i: (i, 0)),   # logits, native dtype
                pl.BlockSpec((tm, 1), lambda i: (i, 0)),   # gold labels
            ],
            out_specs=pl.BlockSpec((1, 8, 128), lambda i: (i, 0, 0)),
        ),
        compiler_params=pltpu.CompilerParams(
            dimension_semantics=("parallel",),             # shard tiles across TCs
            vmem_limit_bytes=vmem_limit),
    )(pred, gold)

    loss = jnp.sum(partials) / jnp.float32(n)
    if use_smoothing:
        # PyTorch's `loss[torch.isfinite(loss)].mean()` on a scalar: identity
        # when finite, NaN (mean of empty) otherwise.
        loss = jnp.where(jnp.isfinite(loss), loss, jnp.float32(jnp.nan))
    return loss


def _reference(pred, gold, use_smoothing=True, eps=0.2):
    eps = eps if use_smoothing else 0.0
    if pred.ndim > 2:
        pred = pred.reshape(-1, pred.shape[-1])
    gold = gold.reshape(-1)
    c = pred.shape[-1]
    one_hot = jax.nn.one_hot(gold, c, dtype=jnp.float32)
    one_hot = one_hot * (1 - eps) + (1 - one_hot) * eps / (c - 1)
    log_prb = jax.nn.log_softmax(pred.astype(jnp.float32), axis=1)
    return -(one_hot * log_prb).sum(axis=1).mean()


if __name__ == "__main__":
    key = jax.random.PRNGKey(0)
    k1, k2, k3, k4, k5, k6 = jax.random.split(key, 6)

    # Case 1: shapes implied by the module -- logits (B, S, C), labels (B, S).
    B, S, C = 2, 8, 32
    pred = jax.random.normal(k1, (B, S, C), dtype=jnp.float32)
    gold = jax.random.randint(k2, (B, S), 0, C, dtype=jnp.int32)

    loss = smooth_cross_entropy(pred, gold, use_smoothing=True, eps=0.2)
    jax.block_until_ready(loss)
    ref = _reference(pred, gold, use_smoothing=True, eps=0.2)
    assert jnp.allclose(loss, ref, atol=1e-4, rtol=1e-4), (loss, ref)

    loss_ns = smooth_cross_entropy(pred, gold, use_smoothing=False)
    jax.block_until_ready(loss_ns)
    ref_ns = _reference(pred, gold, use_smoothing=False)
    assert jnp.allclose(loss_ns, ref_ns, atol=1e-4, rtol=1e-4), (loss_ns, ref_ns)

    # Case 2: uneven row count -> multi-tile grid with a masked final tile.
    N2, C2 = 200, 128
    pred2 = jax.random.normal(k3, (N2, C2), dtype=jnp.float32)
    gold2 = jax.random.randint(k4, (N2,), 0, C2, dtype=jnp.int32)
    loss2 = smooth_cross_entropy(pred2, gold2, use_smoothing=True, eps=0.1, tm=64)
    jax.block_until_ready(loss2)
    ref2 = _reference(pred2, gold2, use_smoothing=True, eps=0.1)
    assert jnp.allclose(loss2, ref2, atol=1e-4, rtol=1e-4), (loss2, ref2)

    # Case 3: bf16 logits -> exercises native-dtype DMA + native gather/max path.
    N3, C3 = 64, 256
    pred3 = jax.random.normal(k5, (N3, C3), dtype=jnp.bfloat16)
    gold3 = jax.random.randint(k6, (N3,), 0, C3, dtype=jnp.int32)
    loss3 = smooth_cross_entropy(pred3, gold3, use_smoothing=True, eps=0.2)
    jax.block_until_ready(loss3)
    ref3 = _reference(pred3, gold3, use_smoothing=True, eps=0.2)
    assert jnp.allclose(loss3, ref3, atol=1e-3, rtol=1e-3), (loss3, ref3)

    print("KERNEL_OK")
</pallas_src>

<mosaic_0001>
module attributes {stable_mosaic.version = 11 : i64} {
  func.func @_smooth_ce_kernel(%arg0: i32, %arg1: memref<8x32xf32, #tpu.memory_space<vmem>>, %arg2: memref<8x1xi32, #tpu.memory_space<vmem>>, %arg3: memref<1x8x128xf32, #tpu.memory_space<vmem>>) attributes {dimension_semantics = [#tpu.dimension_semantics<parallel>], iteration_bounds = array<i64: 2>, scalar_prefetch = 0 : i64, scratch_operands = 0 : i64, tpu.core_type = #tpu.core_type<tc>, window_params = [{transform_indices = @transform_0, window_bounds = array<i64: 8, 32>}, {transform_indices = @transform_1, window_bounds = array<i64: 8, 1>}, {transform_indices = @transform_2, window_bounds = array<i64: 1, 8, 128>}]} {
    %c0 = arith.constant 0 : index
    %c0_0 = arith.constant 0 : index
    %0 = vector.load %arg1[%c0, %c0_0] : memref<8x32xf32, #tpu.memory_space<vmem>>, vector<8x32xf32>
    %c0_1 = arith.constant 0 : index
    %c0_2 = arith.constant 0 : index
    %1 = vector.load %arg2[%c0_1, %c0_2] : memref<8x1xi32, #tpu.memory_space<vmem>>, vector<8x1xi32>
    %2 = tpu.iota {dimensions = array<i32: 1>} : vector<8x32xi32>
    %3 = vector.broadcast %1 : vector<8x1xi32> to vector<8x32xi32>
    %4 = arith.cmpi eq, %2, %3 : vector<8x32xi32>
    %cst = arith.constant 0.000000e+00 : f32
    %5 = vector.broadcast %cst : f32 to vector<8x32xf32>
    %6 = arith.select %4, %0, %5 : vector<8x32xi1>, vector<8x32xf32>
    %cst_3 = arith.constant dense<0.000000e+00> : vector<8xf32>
    %7 = vector.multi_reduction <add>, %6, %cst_3 [1] : vector<8x32xf32> to vector<8xf32>
    %8 = vector.shape_cast %7 : vector<8xf32> to vector<8x1xf32>
    %cst_4 = arith.constant dense<0xFF800000> : vector<8xf32>
    %9 = vector.multi_reduction <maximumf>, %0, %cst_4 [1] : vector<8x32xf32> to vector<8xf32>
    %10 = vector.shape_cast %9 : vector<8xf32> to vector<8x1xf32>
    %cst_5 = arith.constant dense<0.000000e+00> : vector<8xf32>
    %11 = vector.multi_reduction <add>, %0, %cst_5 [1] : vector<8x32xf32> to vector<8xf32>
    %12 = vector.shape_cast %11 : vector<8xf32> to vector<8x1xf32>
    %13 = vector.broadcast %10 : vector<8x1xf32> to vector<8x32xf32>
    %14 = arith.subf %0, %13 : vector<8x32xf32>
    %15 = math.exp %14 : vector<8x32xf32>
    %cst_6 = arith.constant dense<0.000000e+00> : vector<8xf32>
    %16 = vector.multi_reduction <add>, %15, %cst_6 [1] : vector<8x32xf32> to vector<8xf32>
    %17 = vector.shape_cast %16 : vector<8xf32> to vector<8x1xf32>
    %18 = math.log %17 : vector<8x1xf32>
    %cst_7 = arith.constant 3.200000e+01 : f32
    %19 = vector.broadcast %cst_7 : f32 to vector<8x1xf32>
    %20 = arith.mulf %19, %10 : vector<8x1xf32>
    %21 = arith.subf %12, %20 : vector<8x1xf32>
    %22 = arith.subf %8, %10 : vector<8x1xf32>
    %cst_8 = arith.constant 3.200000e+01 : f32
    %23 = vector.broadcast %cst_8 : f32 to vector<8x1xf32>
    %24 = arith.mulf %23, %18 : vector<8x1xf32>
    %25 = arith.subf %21, %24 : vector<8x1xf32>
    %cst_9 = arith.constant -0.0064516128 : f32
    %26 = vector.broadcast %cst_9 : f32 to vector<8x1xf32>
    %27 = arith.mulf %26, %25 : vector<8x1xf32>
    %28 = arith.subf %22, %18 : vector<8x1xf32>
    %cst_10 = arith.constant 0.793548405 : f32
    %29 = vector.broadcast %cst_10 : f32 to vector<8x1xf32>
    %30 = arith.mulf %29, %28 : vector<8x1xf32>
    %31 = arith.subf %27, %30 : vector<8x1xf32>
    %c8_i32 = arith.constant 8 : i32
    %32 = arith.muli %arg0, %c8_i32 : i32
    %33 = tpu.iota {dimensions = array<i32: 0>} : vector<8x1xi32>
    %34 = vector.broadcast %32 : i32 to vector<8x1xi32>
    %35 = arith.addi %34, %33 : vector<8x1xi32>
    %c16_i32 = arith.constant 16 : i32
    %36 = vector.broadcast %c16_i32 : i32 to vector<8x1xi32>
    %37 = arith.cmpi slt, %35, %36 : vector<8x1xi32>
    %cst_11 = arith.constant 0.000000e+00 : f32
    %38 = vector.broadcast %cst_11 : f32 to vector<8x1xf32>
    %39 = arith.select %37, %31, %38 : vector<8x1xi1>, vector<8x1xf32>
    %40 = vector.shape_cast %39 : vector<8x1xf32> to vector<1x8x1xf32>
    %cst_12 = arith.constant dense<0.000000e+00> : vector<1xf32>
    %41 = vector.multi_reduction <add>, %40, %cst_12 [1, 2] : vector<1x8x1xf32> to vector<1xf32>
    %42 = vector.shape_cast %41 : vector<1xf32> to vector<1x1x1xf32>
    %43 = vector.extract %42[0, 0, 0] : f32 from vector<1x1x1xf32>
    %44 = tpu.iota {dimensions = array<i32: 1>} : vector<1x8x128xi32>
    %45 = tpu.iota {dimensions = array<i32: 2>} : vector<1x8x128xi32>
    %c0_i32 = arith.constant 0 : i32
    %46 = vector.broadcast %c0_i32 : i32 to vector<1x8x128xi32>
    %47 = arith.cmpi eq, %44, %46 : vector<1x8x128xi32>
    %c0_i32_13 = arith.constant 0 : i32
    %48 = vector.broadcast %c0_i32_13 : i32 to vector<1x8x128xi32>
    %49 = arith.cmpi eq, %45, %48 : vector<1x8x128xi32>
    %50 = arith.andi %47, %49 : vector<1x8x128xi1>
    %cst_14 = arith.constant 0.000000e+00 : f32
    %51 = vector.broadcast %43 : f32 to vector<1x8x128xf32>
    %52 = vector.broadcast %cst_14 : f32 to vector<1x8x128xf32>
    %53 = arith.select %50, %51, %52 : vector<1x8x128xi1>, vector<1x8x128xf32>
    %c0_15 = arith.constant 0 : index
    %c0_16 = arith.constant 0 : index
    %c0_17 = arith.constant 0 : index
    %54 = vector.load %arg3[%c0_15, %c0_16, %c0_17] : memref<1x8x128xf32, #tpu.memory_space<vmem>>, vector<1x8x128xf32>
    tpu.vector_store %arg3[%c0_15, %c0_16, %c0_17], %53 {strides = array<i32>} : memref<1x8x128xf32, #tpu.memory_space<vmem>>, vector<1x8x128xf32>,
    return
  }
  func.func @transform_0(%arg0: i32) -> (i32, i32) {
    %c0_i32 = arith.constant 0 : i32
    %c0_i32_0 = arith.constant 0 : i32
    return %arg0, %c0_i32 : i32, i32
  }
  func.func @transform_1(%arg0: i32) -> (i32, i32) {
    %c0_i32 = arith.constant 0 : i32
    %c0_i32_0 = arith.constant 0 : i32
    return %arg0, %c0_i32 : i32, i32
  }
  func.func @transform_2(%arg0: i32) -> (i32, i32, i32) {
    %c0_i32 = arith.constant 0 : i32
    %c0_i32_0 = arith.constant 0 : i32
    %c0_i32_1 = arith.constant 0 : i32
    return %arg0, %c0_i32, %c0_i32_0 : i32, i32, i32
  }
}

</mosaic_0001>

<bundles_post_ra>
// kernel: tpu_custom_call.1
= control target key start
LH: loop header
LB: loop body
LE: loop exit
PB: predicated region body
PF: predicated region fallthrough
CT: control target
= control target key end

     0   :  { %7 = vsyncpa [#allocation3], 0  ;;  %s538_s0 = inlined_call_operand.vmem [shape: f32[16,32], index: 0, kind: input, shape index: {}]   ;;  %s539_s1 = inlined_call_operand.vmem [shape: s32[16,1], index: 1, kind: input, shape index: {}]   ;;  %s540_s2 = inlined_call_operand.hbm [shape: f32[2,8,128], index: 2, kind: output, shape index: {}]  }
   0x1   :  { %9 = vsyncpa [#allocation3 + $0x1], 0  ;;  %s442_s9 = smov 0   ;;  %s444_s10 = smov 0  }
   0x2   :  { %s446_s11 = smov 0   ;;  %s448_s12 = smov 0  }
   0x3 LB: > { %s463_s13 = sadd.s32 4294967295, %s424_s12   ;;  %s303_s14 = sadd.s32 4294967294, %s424_s12   ;;  %s424_s12 = sphi %s448_s12, %s546_s12   ;;  %s420_s11 = sphi %s446_s11, %s545_s11   ;;  %s416_s10 = sphi %s444_s10, %s544_s10   ;;  %s412_s9 = sphi %s442_s9, %s543_s9  }
   0x4   : > { %s467_s15 = sadd.s32 1, %s424_s12   ;;  %s74_s16 = sadd.s32 1, %s420_s11 }
   0x5   : > { %s71_s17 = ssub.s32 %s424_s12, %s467_s15  ;;  %p84_p0 = scmp.ne.s32.totalorder %s420_s11, %s416_s10 }
   0x6   : > { %p72_p1 = scmp.eq.s32.totalorder %s71_s17, 0  ;;  %p85_p2 = scmp.eq.s32.totalorder %s463_s13, 1 }
   0x7   : > { %p90_p3 = scmp.ne.s32.totalorder %s416_s10, %s412_s9  ;;  %p91_p4 = scmp.eq.s32.totalorder %s303_s14, 1 }
   0x8   : > { %s478_s18 = scalar_select %p72_p1, %s420_s11, %s74_s16  }
   0x9   : > { %p480_p5 = por %p85_p2, %p84_p0  ;;  %p484_p6 = por %p91_p4, %p90_p3 }
   0xa   : > { %p306_p7 = scmp.ge.s32.totalorder %s424_s12, 1  ;;  %p123_p8 = scmp.lt.s32.totalorder %s424_s12, 3 }
   0xc   : > { %p124_p9 = pnand %p306_p7, %p123_p8 }
   0xd   : > { %p148_p10 = scmp.lt.s32.totalorder (!%p124_p9), %s463_s13, 1  ;;  %s310_s29 = sshll.u32 (!%p124_p9), %s463_s13, 3 }
   0xe   : > { %127 = sbr.rel (%p124_p9) target bundleno = 472 (0x1d8), region = 28  ;;  %s145_s30 = sand.u32 (!%p124_p9), 1, %s416_s10  }
   0xf   : > { %s307_s3 = sshll.u32 (!%p124_p9), %s145_s30, 3  ;;  %s227_s6 = scalar_lea.hbm (!%p124_p9), %s540_s2, %s310_s29 }
  0x10   : > { %s147_s7 = scalar_lea.vmem (!%p124_p9), [#allocation2], %s307_s3  ;;  %s231_s14 = sshll.u32 (!%p124_p9), %s227_s6, 4  ;;  %s232_s14 = int_to_ptr.hbm [resolvable:$true] %s231_s14 }
  0x11   : > { %s229_s8 = sshll.u32 (!%p124_p9), %s147_s7, 4  ;;  %s217_s17 = scalar_lea.sflag (!%p124_p9), [#allocation3], %s145_s30  ;;  %s230_s8 = int_to_ptr.vmem [resolvable:$true] %s229_s8 }
  0x12   : > { %s382_s24 = scalar_lea.hbm (!%p124_p9), %s540_s2, 16 }
  0x13   : > { %v426_v0 = vmov 0   ;;  %s149_s21 = scalar_select %p148_p10, %s463_s13, 1  ;;  %vm165_vm0 = vcmask 261120   ;;  %v158_v10 = vlaneseq  ;;  %v195_v21 = vstv %s310_s29 }
  0x14   : > { %357 = vset.pattern.permute.xlu0 %v426_v0  ;;  %vm199_vm3 = vcmask 7168  }
  0x15   : > { %s308_s22 = sshll.u32 %s149_s21, 3  ;;  %v159_v11 = vand.u32 127, %v158_v10  ;;  %v194_v20 = vshrl.u32 %v158_v10, 7  ;;  %s376_s21 = sshra.s32 %s232_s14, 4  ;;  %s377_s21 = int_to_ptr.hbm [resolvable:$true] %s376_s21 }
  0x16   : > { %s151_s25 = scalar_lea.vmem %s538_s0, %s308_s22  ;;  %s155_s28 = scalar_lea.vmem %s539_s1, %s308_s22 }
  0x17   : > { %v156_v1 = vld [vmem:[%s151_s25] sm:$0xff]  ;;  %v196_v27 = vadd.s32 %v195_v21, %v194_v20  ;;  %vm210_vm4 = vcmp.eq.s32.totalorder %v194_v20, 0  ;;  %vm211_vm5 = vcmp.eq.s32.totalorder %v159_v11, 0  ;;  %s378_s13 = scalar_lea.hbm %s377_s21, 8  ;;  %p383_p0 = scmp.lt.s32.totalorder %s377_s21, %s540_s2 }
  0x18   : > { %v169_v2 = vsel %vm165_vm0, %v156_v1, -inf  ;;  %v172_v3 = vsel %vm165_vm0, %v156_v1, 0.0  ;;  %v157_v4 = vld [vmem:[%s155_s28] sm:$0xff]  ;;  %vm212_vm6 = vmand %vm210_vm4, %vm211_vm5  ;;  %p379_p11 = scmp.ne.s32.totalorder %s377_s21, %s378_s13  ;;  %p384_p1 = scmp.lt.s32.totalorder %s382_s24, %s378_s13 }
  0x19   : > { %170 = vmax.xlane.f32.xlu0 %v169_v2  ;;  %173 = vadd.xlane.f32.xlu2 %v172_v3  ;;  %vm197_vm2 = vcmp.lt.s32.totalorder %v196_v27, 16 }
  0x1a   : > { %p380_p12 = pnand %p379_p11, %p480_p5  ;;  %p385_p2 = por %p384_p1, %p383_p0 }
  0x1c   : > { %p381_p13 = pneg %p380_p12 }
  0x1e   : > { %p386_p3 = pnand %p385_p2, %p381_p13 }
  0x2d   : > { %161 = vperm.xlu0 %357, %v157_v4  }
  0x8c   : > { %v171_v5 = vpop.xlane.xlu0 %170  ;;  %v174_v18 = vpop.xlane.xlu2 %173 }
  0x8d   : > { %v175_v6 = vsub.f32 %v156_v1, %v171_v5  ;;  %v183_v16 = vmul.f32 32.0, %v171_v5 }
  0x8f   : > { %v176_v7 = vmul.f32 1.442695, %v175_v6  ;;  %v184_v22 = vsub.f32 %v174_v18, %v183_v16 }
  0x91   : > { %358 = vpow2.f32 %v176_v7 }
  0x97   : > { %v359_v8 = vpop.eup %358 }
  0x98   : > { %v178_v9 = vsel %vm165_vm0, %v359_v8, 0.0 }
  0x99   : > { %179 = vadd.xlane.f32.xlu1 %v178_v9 }
  0x9f   : > { %v162_v12 = vpop.permute.xlu0 %161 }
  0xa0   : > { %vm163_vm1 = vcmp.eq.s32.totalorder %v159_v11, %v162_v12 }
  0xa1   : > { %v164_v13 = vsel %vm163_vm1, %v156_v1, 0.0 }
  0xa2   : > { %v166_v14 = vsel %vm165_vm0, %v164_v13, 0.0 }
  0xa3   : > { %167 = vadd.xlane.f32.xlu1 %v166_v14 }
 0x10c   : > { %v180_v15 = vpop.xlane.xlu1 %179 }
 0x10d   : > { %360 = vlog2.f32 %v180_v15 }
 0x113   : > { %v361_v17 = vpop.eup %360 }
 0x114   : > { %v182_v19 = vmul.f32 0.6931472, %v361_v17 }
 0x116   : > { %v186_v23 = vmul.f32 32.0, %v182_v19  ;;  %v168_v24 = vpop.xlane.xlu1 %167 }
 0x117   : > { %v185_v25 = vsub.f32 %v168_v24, %v171_v5 }
 0x118   : > { %v187_v26 = vsub.f32 %v184_v22, %v186_v23 }
 0x119   : > { %v189_v28 = vsub.f32 %v185_v25, %v182_v19 }
 0x11a   : > { %v188_v29 = vmul.f32 -0.006451613, %v187_v26 }
 0x11b   : > { %v190_v30 = vmul.f32 0.7935484, %v189_v28 }
 0x11d   : > { %v191_v31 = vsub.f32 %v188_v29, %v190_v30 }
 0x11f   : > { %v198_v32 = vsel %vm197_vm2, %v191_v31, 0.0 }
 0x120   : > { %v200_v33 = vsel %vm199_vm3, %v198_v32, 0.0 }
 0x121   : > { %201 = vadd.xlane.f32.xlu2 %v200_v33 }
 0x194   : > { %v202_v34 = vpop.xlane.xlu2 %201 }
 0x195   : > { %v203_v35 = vrot.slane %v202_v34, 4 }
 0x197   : > { %v204_v36 = vadd.f32 %v203_v35, %v202_v34 }
 0x199   : > { %v205_v37 = vrot.slane %v204_v36, 2 }
 0x19b   : > { %v206_v38 = vadd.f32 %v205_v37, %v204_v36 }
 0x19d   : > { %v207_v39 = vrot.slane %v206_v38, 1 }
 0x19f   : > { %v208_v40 = vadd.f32 %v207_v39, %v206_v38 }
 0x1a1   : > { %315 = vpush %v208_v40 }
 0x1d2   : > { %s316_s16 = spop %315 }
 0x1d3   : > { %v213_v41 = vstv %s316_s16 }
 0x1d4   : > { %v214_v42 = vsel %vm212_vm6, %v213_v41, 0.0 }
 0x1d5   : > { %215 = vst [vmem:[%s147_s7] sm:$0xff] %v214_v42 }
 0x1d6   : > { %389 = shalt.err (!%p386_p3)
}
 0x1d7   : > { %317 = dma.vmem_to_hbm [thread:$0]  (%p480_p5), %s230_s8, 128, %s232_s14, %s217_s17  }
 0x1d8 PF: > { %p323_p4 = scmp.ge.s32.totalorder %s424_s12, 2  ;;  %s243_s27 = sand.u32 1, %s412_s9  }
 0x1d9   : > { %s244_s28 = scalar_lea.sflag [#allocation3], %s243_s27 }
 0x1da   : > { %p320_p7 = pnand %p323_p4, %p484_p6 }
 0x1dc   : > { %p321_p8 = pneg %p320_p7 }
 0x1de   : > { %407 = dma.done.wait (%p321_p8), %s244_s28, 128  }
 0x1df   : > { %409 = vsyncadd (%p321_p8), %s244_s28, 4294967168  ;;  %p12_p9 = scmp.ge.s32.totalorder %s467_s15, 4   ;;  %s543_s9 = smov %s416_s10 }
 0x1e0   : > { %s544_s10 = smov %s420_s11  ;;  %s545_s11 = smov %s478_s18 }
 0x1e1   : > { %s546_s12 = smov %s467_s15  ;;  %14 = sbr.rel (!%p12_p9) target bundleno = 3 (0x3), region = 66 }
 0x1e6   :  { %250 = vsyncpa [#allocation3], 1 }
 0x1e7   :  { %252 = vsyncpa [#allocation3 + $0x1], 1 }

</bundles_post_ra>
